<compile_context>
chip_gen: v7x
topology: tpu7x:2x2x1
jax: 0.10.0
libtpu: 0.0.40
codegen_flags: <defaults>
</compile_context>

<pallas_src>
import functools

import jax
import jax.numpy as jnp
from jax import lax
from jax.experimental import pallas as pl
from jax.experimental.pallas import tpu as pltpu


# ---------------------------------------------------------------------------
# Kernels
# ---------------------------------------------------------------------------

def _bin_fused_kernel(x_ref, g_ref, b_ref, o_ref, *, rho, ep, hw):
    """Single-pass path: block = (N, Cb, HW); stats + normalize fused."""
    x = x_ref[...]
    xs = x.astype(jnp.float32)          # f32 accumulation also for bf16 inputs
    n = x.shape[0]
    n_total = n * hw                     # elements per channel for BN stats

    # Per-(sample, channel) sums over the spatial axis.
    sum_in = jnp.sum(xs, axis=2, keepdims=True)                    # (N, Cb, 1)
    mean_in = sum_in / hw                                          # (N, Cb, 1)
    mean_bn = jnp.sum(sum_in, axis=0, keepdims=True) / n_total     # (1, Cb, 1)

    # Centered variances (second sweep over the VMEM-resident tile): no extra
    # HBM traffic, numerically robust, and the VPU/XLU have large slack here.
    d_in = xs - mean_in
    var_in = jnp.sum(d_in * d_in, axis=2, keepdims=True) / (hw - 1)   # unbiased (torch.var)
    d_bn = xs - mean_bn
    var_bn = jnp.sum(jnp.sum(d_bn * d_bn, axis=2, keepdims=True),
                     axis=0, keepdims=True) / n_total                 # population

    inv_bn = lax.rsqrt(var_bn + ep)      # (1, Cb, 1) — EUP, tiny
    inv_in = lax.rsqrt(var_in + ep)      # (N, Cb, 1) — EUP, tiny

    g = g_ref[...][None]                 # (1, Cb, 1), already f32
    b = b_ref[...][None]                 # (1, Cb, 1)

    # Fold BN/IN blend + affine into one per-row scale/shift:
    #   y = gamma*(rho*(x-mean_bn)*inv_bn + (1-rho)*(x-mean_in)*inv_in) + beta
    scale = g * (rho * inv_bn + (1.0 - rho) * inv_in)               # (N, Cb, 1)
    shift = b - g * (rho * mean_bn * inv_bn + (1.0 - rho) * mean_in * inv_in)

    o_ref[...] = (xs * scale + shift).astype(o_ref.dtype)


def _stats_kernel(x_ref, sum_ref, sumsq_ref, *, hw, hwb, need_mask):
    """Two-pass path, pass 1: accumulate per-(sample, channel) sum / sumsq
    over HW tiles. Grid = (channel_blocks, hw_blocks); hw axis is a reduction."""
    h = pl.program_id(1)

    @pl.when(h == 0)
    def _():
        sum_ref[...] = jnp.zeros_like(sum_ref)
        sumsq_ref[...] = jnp.zeros_like(sumsq_ref)

    x = x_ref[...].astype(jnp.float32)
    if need_mask:  # ragged last HW tile: zero the out-of-range lanes
        lane = lax.broadcasted_iota(jnp.int32, x.shape, 2)
        x = jnp.where(h * hwb + lane < hw, x, 0.0)

    sum_ref[...] += jnp.sum(x, axis=2, keepdims=True)
    sumsq_ref[...] += jnp.sum(x * x, axis=2, keepdims=True)


def _norm_kernel(x_ref, scale_ref, shift_ref, o_ref):
    """Two-pass path, pass 2: y = x * scale + shift (scale/shift per (n, c))."""
    x = x_ref[...].astype(jnp.float32)
    o_ref[...] = (x * scale_ref[...] + shift_ref[...]).astype(o_ref.dtype)


# ---------------------------------------------------------------------------
# Tiling policy
# ---------------------------------------------------------------------------

def _vmem_budget():
    """Generation-aware (per-block budget, vmem_limit_bytes)."""
    cap = 128 * 1024 * 1024
    try:
        cap = int(pltpu.get_tpu_info().vmem_capacity_bytes)
    except Exception:
        pass
    # Real footprint ~4x block (x + out, each double-buffered) + scratch.
    budget = max(2 * 1024 * 1024, cap // 8)        # v5e/v6e ~16 MiB, v7x ~8 MiB
    limit = max(16 * 1024 * 1024, (3 * cap) // 4)  # v5e/v6e ~96 MiB, v7x ~48 MiB
    return budget, limit


def _pick_single_pass_cb(C, N, HW, itemsize, budget):
    """Channel block for the fused path (block = (N, Cb, HW)).
    Returns None when even Cb=8 (or Cb=C for C<8) exceeds the budget."""
    per_ch = N * HW * itemsize
    if C * per_ch <= budget:
        cb = C
        # Prefer >= 2 grid steps so the "parallel" axis can shard across
        # v7x's two TensorCores, as long as DMAs stay >= ~1 MiB.
        if C > 8:
            half = (((C + 1) // 2) + 7) // 8 * 8
            if half < C and half * per_ch >= (1 << 20):
                cb = half
        return cb
    cb = (budget // per_ch) // 8 * 8
    if cb < 8 and C > 8:
        return None
    if C <= 8:
        return None  # even the minimal full-HW slab does not fit -> two-pass
    return min(cb, C)


def _pick_two_pass_blocks(C, N, HW, itemsize, budget):
    """(Cb, HWb) for the two-pass path. HWb is a multiple of 128 (or full HW)."""
    cb = C if C <= 8 else 8
    if HW <= 128:
        hwb = HW
    else:
        hwb = max(128, (budget // max(1, N * cb * itemsize)) // 128 * 128)
        hwb = min(hwb, HW)
    return cb, hwb


# ---------------------------------------------------------------------------
# Wrapper
# ---------------------------------------------------------------------------

def batch_instance_norm(x, gamma, beta, *, rho=0.5, ep=1e-5, budget_bytes=None):
    """Training-mode BatchInstanceNorm forward.

    x: (N, C, H, W); gamma/beta: (1, C, 1, 1). `budget_bytes` overrides the
    per-block VMEM budget (testing / tuning only).
    """
    N, C, H, W = x.shape
    HW = H * W
    if HW <= 1:
        # torch.var(unbiased=True) over a single element is NaN — reject early.
        raise ValueError("BatchInstanceNorm requires H*W > 1")

    itemsize = x.dtype.itemsize
    budget, vmem_limit = _vmem_budget()
    if budget_bytes is not None:
        budget = int(budget_bytes)

    rho = float(rho)
    ep = float(ep)

    # Free, layout-preserving reshapes only — no HBM transposes.
    xr = x.reshape(N, C, HW)
    g = gamma.reshape(C, 1).astype(jnp.float32)
    b = beta.reshape(C, 1).astype(jnp.float32)

    cb = _pick_single_pass_cb(C, N, HW, itemsize, budget)

    if cb is not None:
        # ---------------- Fused single-pass path ----------------
        grid = (pl.cdiv(C, cb),)
        out = pl.pallas_call(
            functools.partial(_bin_fused_kernel, rho=rho, ep=ep, hw=HW),
            out_shape=jax.ShapeDtypeStruct((N, C, HW), x.dtype),
            grid=grid,
            in_specs=[
                pl.BlockSpec((N, cb, HW), lambda c: (0, c, 0)),
                pl.BlockSpec((cb, 1), lambda c: (c, 0)),
                pl.BlockSpec((cb, 1), lambda c: (c, 0)),
            ],
            out_specs=pl.BlockSpec((N, cb, HW), lambda c: (0, c, 0)),
            compiler_params=pltpu.CompilerParams(
                dimension_semantics=("parallel",),
                vmem_limit_bytes=vmem_limit,
            ),
        )(xr, g, b)
        return out.reshape(N, C, H, W)

    # ---------------- Two-pass path (large N*HW) ----------------
    cb, hwb = _pick_two_pass_blocks(C, N, HW, itemsize, budget)
    c_grid = pl.cdiv(C, cb)
    h_grid = pl.cdiv(HW, hwb)
    need_mask = (HW % hwb) != 0

    # Pass 1: per-(sample, channel) sum and sum-of-squares over HW.
    sums, sumsq = pl.pallas_call(
        functools.partial(_stats_kernel, hw=HW, hwb=hwb, need_mask=need_mask),
        out_shape=(
            jax.ShapeDtypeStruct((N, C, 1), jnp.float32),
            jax.ShapeDtypeStruct((N, C, 1), jnp.float32),
        ),
        grid=(c_grid, h_grid),
        in_specs=[pl.BlockSpec((N, cb, hwb), lambda c, h: (0, c, h))],
        out_specs=(
            pl.BlockSpec((N, cb, 1), lambda c, h: (0, c, 0)),
            pl.BlockSpec((N, cb, 1), lambda c, h: (0, c, 0)),
        ),
        compiler_params=pltpu.CompilerParams(
            dimension_semantics=("parallel", "arbitrary"),
            vmem_limit_bytes=vmem_limit,
        ),
    )(xr)

    # Tiny (N, C, 1) stats -> per-row scale/shift in plain JAX (negligible).
    mean_in = sums / HW
    var_in = jnp.maximum((sumsq - HW * mean_in * mean_in) / (HW - 1), 0.0)
    sum_all = jnp.sum(sums, axis=0, keepdims=True)
    sumsq_all = jnp.sum(sumsq, axis=0, keepdims=True)
    n_total = N * HW
    mean_bn = sum_all / n_total
    var_bn = jnp.maximum(sumsq_all / n_total - mean_bn * mean_bn, 0.0)
    inv_bn = lax.rsqrt(var_bn + ep)
    inv_in = lax.rsqrt(var_in + ep)
    g3 = g.reshape(1, C, 1)
    b3 = b.reshape(1, C, 1)
    scale = g3 * (rho * inv_bn + (1.0 - rho) * inv_in)                          # (N, C, 1)
    shift = b3 - g3 * (rho * mean_bn * inv_bn + (1.0 - rho) * mean_in * inv_in)  # (N, C, 1)
    scale = jnp.broadcast_to(scale, (N, C, 1)).astype(jnp.float32)
    shift = jnp.broadcast_to(shift, (N, C, 1)).astype(jnp.float32)

    # Pass 2: y = x * scale + shift over the same (C, HW) tiling.
    out = pl.pallas_call(
        _norm_kernel,
        out_shape=jax.ShapeDtypeStruct((N, C, HW), x.dtype),
        grid=(c_grid, h_grid),
        in_specs=[
            pl.BlockSpec((N, cb, hwb), lambda c, h: (0, c, h)),
            pl.BlockSpec((N, cb, 1), lambda c, h: (0, c, 0)),
            pl.BlockSpec((N, cb, 1), lambda c, h: (0, c, 0)),
        ],
        out_specs=pl.BlockSpec((N, cb, hwb), lambda c, h: (0, c, h)),
        compiler_params=pltpu.CompilerParams(
            dimension_semantics=("parallel", "parallel"),
            vmem_limit_bytes=vmem_limit,
        ),
    )(xr, scale, shift)
    return out.reshape(N, C, H, W)


# ---------------------------------------------------------------------------
# Reference + self-test
# ---------------------------------------------------------------------------

def _reference(x, gamma, beta, rho=0.5, ep=1e-5):
    """Pure-JAX reference mirroring the PyTorch forward (training branch)."""
    x = x.astype(jnp.float32)
    gamma = gamma.astype(jnp.float32)
    beta = beta.astype(jnp.float32)
    mean_bn = jnp.mean(x, axis=(0, 2, 3), keepdims=True)
    var_bn = jnp.mean((x - mean_bn) ** 2, axis=(0, 2, 3), keepdims=True)
    x_bn = (x - mean_bn) / jnp.sqrt(var_bn + ep)
    hw = x.shape[2] * x.shape[3]
    mean_in = jnp.mean(x, axis=(2, 3), keepdims=True)
    var_in = jnp.sum((x - mean_in) ** 2, axis=(2, 3), keepdims=True) / (hw - 1)
    x_in = (x - mean_in) / jnp.sqrt(var_in + ep)
    y = rho * x_bn + (1.0 - rho) * x_in
    return y * gamma + beta


if __name__ == "__main__":
    key = jax.random.PRNGKey(0)
    k1, k2, k3, k4, k5 = jax.random.split(key, 5)

    # 1) Module-faithful small case (fused single-pass path).
    N, C, H, W = 2, 4, 16, 16
    x = jax.random.normal(k1, (N, C, H, W), dtype=jnp.float32)
    gamma = jnp.ones((1, C, 1, 1), dtype=jnp.float32)   # nn.init.ones_
    beta = jnp.zeros((1, C, 1, 1), dtype=jnp.float32)   # nn.init.zeros_
    out = jax.block_until_ready(batch_instance_norm(x, gamma, beta, rho=0.5, ep=1e-5))
    ref = _reference(x, gamma, beta)
    assert out.shape == (N, C, H, W)
    assert jnp.allclose(out, ref, atol=1e-4, rtol=1e-4), "single-pass mismatch"

    # 2) Ragged channels + ragged HW, two-pass path (forced via a tiny budget).
    N, C, H, W = 2, 12, 10, 13
    x = jax.random.normal(k2, (N, C, H, W), dtype=jnp.float32)
    gamma = 1.0 + 0.1 * jax.random.normal(k3, (1, C, 1, 1), dtype=jnp.float32)
    beta = 0.1 * jax.random.normal(k4, (1, C, 1, 1), dtype=jnp.float32)
    out = jax.block_until_ready(
        batch_instance_norm(x, gamma, beta, rho=0.5, ep=1e-5, budget_bytes=8 * 1024))
    ref = _reference(x, gamma, beta)
    assert out.shape == (N, C, H, W)
    assert jnp.allclose(out, ref, atol=1e-4, rtol=1e-4), "two-pass mismatch"

    # 3) bf16 input: f32 stat accumulation, bf16 output (fused path).
    N, C, H, W = 2, 16, 8, 16
    x = jax.random.normal(k5, (N, C, H, W), dtype=jnp.float32).astype(jnp.bfloat16)
    gamma = jnp.ones((1, C, 1, 1), dtype=jnp.float32)
    beta = jnp.zeros((1, C, 1, 1), dtype=jnp.float32)
    out = jax.block_until_ready(batch_instance_norm(x, gamma, beta, rho=0.5, ep=1e-5))
    assert out.dtype == jnp.bfloat16
    ref = _reference(x.astype(jnp.float32), gamma, beta)
    assert jnp.allclose(out.astype(jnp.float32), ref, atol=5e-2, rtol=5e-2), "bf16 mismatch"

    print("KERNEL_OK")
</pallas_src>

<mosaic_0001>
module attributes {stable_mosaic.version = 11 : i64} {
  func.func @_bin_fused_kernel(%arg0: i32, %arg1: memref<2x4x256xf32, #tpu.memory_space<vmem>>, %arg2: memref<4x1xf32, #tpu.memory_space<vmem>>, %arg3: memref<4x1xf32, #tpu.memory_space<vmem>>, %arg4: memref<2x4x256xf32, #tpu.memory_space<vmem>>) attributes {dimension_semantics = [#tpu.dimension_semantics<parallel>], iteration_bounds = array<i64: 1>, scalar_prefetch = 0 : i64, scratch_operands = 0 : i64, tpu.core_type = #tpu.core_type<tc>, window_params = [{transform_indices = @transform_0, window_bounds = array<i64: 2, 4, 256>}, {transform_indices = @transform_1, window_bounds = array<i64: 4, 1>}, {transform_indices = @transform_2, window_bounds = array<i64: 4, 1>}, {transform_indices = @transform_3, window_bounds = array<i64: 2, 4, 256>}]} {
    %c0 = arith.constant 0 : index
    %c0_0 = arith.constant 0 : index
    %c0_1 = arith.constant 0 : index
    %0 = vector.load %arg1[%c0, %c0_0, %c0_1] : memref<2x4x256xf32, #tpu.memory_space<vmem>>, vector<2x4x256xf32>
    %cst = arith.constant dense<0.000000e+00> : vector<2x4xf32>
    %1 = vector.multi_reduction <add>, %0, %cst [2] : vector<2x4x256xf32> to vector<2x4xf32>
    %2 = vector.shape_cast %1 : vector<2x4xf32> to vector<2x4x1xf32>
    %cst_2 = arith.constant 2.560000e+02 : f32
    %3 = vector.broadcast %cst_2 : f32 to vector<2x4x1xf32>
    %4 = arith.divf %2, %3 : vector<2x4x1xf32>
    %cst_3 = arith.constant dense<0.000000e+00> : vector<4x1xf32>
    %5 = vector.multi_reduction <add>, %2, %cst_3 [0] : vector<2x4x1xf32> to vector<4x1xf32>
    %6 = vector.shape_cast %5 : vector<4x1xf32> to vector<1x4x1xf32>
    %cst_4 = arith.constant 5.120000e+02 : f32
    %7 = vector.broadcast %cst_4 : f32 to vector<1x4x1xf32>
    %8 = arith.divf %6, %7 : vector<1x4x1xf32>
    %9 = vector.broadcast %4 : vector<2x4x1xf32> to vector<2x4x256xf32>
    %10 = arith.subf %0, %9 : vector<2x4x256xf32>
    %11 = arith.mulf %10, %10 : vector<2x4x256xf32>
    %cst_5 = arith.constant dense<0.000000e+00> : vector<2x4xf32>
    %12 = vector.multi_reduction <add>, %11, %cst_5 [2] : vector<2x4x256xf32> to vector<2x4xf32>
    %13 = vector.shape_cast %12 : vector<2x4xf32> to vector<2x4x1xf32>
    %cst_6 = arith.constant 2.550000e+02 : f32
    %14 = vector.broadcast %cst_6 : f32 to vector<2x4x1xf32>
    %15 = arith.divf %13, %14 : vector<2x4x1xf32>
    %16 = vector.broadcast %8 : vector<1x4x1xf32> to vector<2x4x256xf32>
    %17 = arith.subf %0, %16 : vector<2x4x256xf32>
    %18 = arith.mulf %17, %17 : vector<2x4x256xf32>
    %cst_7 = arith.constant dense<0.000000e+00> : vector<2x4xf32>
    %19 = vector.multi_reduction <add>, %18, %cst_7 [2] : vector<2x4x256xf32> to vector<2x4xf32>
    %20 = vector.shape_cast %19 : vector<2x4xf32> to vector<2x4x1xf32>
    %cst_8 = arith.constant dense<0.000000e+00> : vector<4x1xf32>
    %21 = vector.multi_reduction <add>, %20, %cst_8 [0] : vector<2x4x1xf32> to vector<4x1xf32>
    %22 = vector.shape_cast %21 : vector<4x1xf32> to vector<1x4x1xf32>
    %cst_9 = arith.constant 5.120000e+02 : f32
    %23 = vector.broadcast %cst_9 : f32 to vector<1x4x1xf32>
    %24 = arith.divf %22, %23 : vector<1x4x1xf32>
    %cst_10 = arith.constant 9.99999974E-6 : f32
    %25 = vector.broadcast %cst_10 : f32 to vector<1x4x1xf32>
    %26 = arith.addf %24, %25 : vector<1x4x1xf32>
    %27 = math.rsqrt %26 : vector<1x4x1xf32>
    %cst_11 = arith.constant 9.99999974E-6 : f32
    %28 = vector.broadcast %cst_11 : f32 to vector<2x4x1xf32>
    %29 = arith.addf %15, %28 : vector<2x4x1xf32>
    %30 = math.rsqrt %29 : vector<2x4x1xf32>
    %c0_12 = arith.constant 0 : index
    %c0_13 = arith.constant 0 : index
    %31 = vector.load %arg2[%c0_12, %c0_13] : memref<4x1xf32, #tpu.memory_space<vmem>>, vector<4x1xf32>
    %32 = vector.shape_cast %31 : vector<4x1xf32> to vector<1x4x1xf32>
    %c0_14 = arith.constant 0 : index
    %c0_15 = arith.constant 0 : index
    %33 = vector.load %arg3[%c0_14, %c0_15] : memref<4x1xf32, #tpu.memory_space<vmem>>, vector<4x1xf32>
    %34 = vector.shape_cast %33 : vector<4x1xf32> to vector<1x4x1xf32>
    %cst_16 = arith.constant 5.000000e-01 : f32
    %35 = vector.broadcast %cst_16 : f32 to vector<1x4x1xf32>
    %36 = arith.mulf %35, %27 : vector<1x4x1xf32>
    %cst_17 = arith.constant 5.000000e-01 : f32
    %37 = vector.broadcast %cst_17 : f32 to vector<2x4x1xf32>
    %38 = arith.mulf %37, %30 : vector<2x4x1xf32>
    %39 = vector.broadcast %36 : vector<1x4x1xf32> to vector<2x4x1xf32>
    %40 = arith.addf %39, %38 : vector<2x4x1xf32>
    %41 = vector.broadcast %32 : vector<1x4x1xf32> to vector<2x4x1xf32>
    %42 = arith.mulf %41, %40 : vector<2x4x1xf32>
    %cst_18 = arith.constant 5.000000e-01 : f32
    %43 = vector.broadcast %cst_18 : f32 to vector<1x4x1xf32>
    %44 = arith.mulf %43, %8 : vector<1x4x1xf32>
    %45 = arith.mulf %44, %27 : vector<1x4x1xf32>
    %cst_19 = arith.constant 5.000000e-01 : f32
    %46 = vector.broadcast %cst_19 : f32 to vector<2x4x1xf32>
    %47 = arith.mulf %46, %4 : vector<2x4x1xf32>
    %48 = arith.mulf %47, %30 : vector<2x4x1xf32>
    %49 = vector.broadcast %45 : vector<1x4x1xf32> to vector<2x4x1xf32>
    %50 = arith.addf %49, %48 : vector<2x4x1xf32>
    %51 = vector.broadcast %32 : vector<1x4x1xf32> to vector<2x4x1xf32>
    %52 = arith.mulf %51, %50 : vector<2x4x1xf32>
    %53 = vector.broadcast %34 : vector<1x4x1xf32> to vector<2x4x1xf32>
    %54 = arith.subf %53, %52 : vector<2x4x1xf32>
    %55 = vector.broadcast %42 : vector<2x4x1xf32> to vector<2x4x256xf32>
    %56 = arith.mulf %0, %55 : vector<2x4x256xf32>
    %57 = vector.broadcast %54 : vector<2x4x1xf32> to vector<2x4x256xf32>
    %58 = arith.addf %56, %57 : vector<2x4x256xf32>
    %c0_20 = arith.constant 0 : index
    %c0_21 = arith.constant 0 : index
    %c0_22 = arith.constant 0 : index
    %59 = vector.load %arg4[%c0_20, %c0_21, %c0_22] : memref<2x4x256xf32, #tpu.memory_space<vmem>>, vector<2x4x256xf32>
    tpu.vector_store %arg4[%c0_20, %c0_21, %c0_22], %58 {strides = array<i32>} : memref<2x4x256xf32, #tpu.memory_space<vmem>>, vector<2x4x256xf32>,
    return
  }
  func.func @transform_0(%arg0: i32) -> (i32, i32, i32) {
    %c0_i32 = arith.constant 0 : i32
    %c0_i32_0 = arith.constant 0 : i32
    %c0_i32_1 = arith.constant 0 : i32
    return %c0_i32, %arg0, %c0_i32_0 : i32, i32, i32
  }
  func.func @transform_1(%arg0: i32) -> (i32, i32) {
    %c0_i32 = arith.constant 0 : i32
    %c0_i32_0 = arith.constant 0 : i32
    return %arg0, %c0_i32 : i32, i32
  }
  func.func @transform_2(%arg0: i32) -> (i32, i32) {
    %c0_i32 = arith.constant 0 : i32
    %c0_i32_0 = arith.constant 0 : i32
    return %arg0, %c0_i32 : i32, i32
  }
  func.func @transform_3(%arg0: i32) -> (i32, i32, i32) {
    %c0_i32 = arith.constant 0 : i32
    %c0_i32_0 = arith.constant 0 : i32
    %c0_i32_1 = arith.constant 0 : i32
    return %c0_i32, %arg0, %c0_i32_0 : i32, i32, i32
  }
}

</mosaic_0001>

<bundles_post_ra>
// kernel: tpu_custom_call.1
= control target key start
LH: loop header
LB: loop body
LE: loop exit
PB: predicated region body
PF: predicated region fallthrough
CT: control target
= control target key end

     0   :  { %8 = vsyncpa [#allocation3], 0  ;;  %s494_s0 = inlined_call_operand.hbm [shape: f32[2,4,256], index: 0, kind: input, shape index: {}]   ;;  %s495_s1 = inlined_call_operand.hbm [shape: f32[4,1], index: 1, kind: input, shape index: {}]   ;;  %s496_s2 = inlined_call_operand.hbm [shape: f32[4,1], index: 2, kind: input, shape index: {}]   ;;  %s497_s3 = inlined_call_operand.hbm [shape: f32[2,4,256], index: 3, kind: output, shape index: {}]  }
   0x1   :  { %9 = vsyncpa [#allocation6], 0 }
   0x2   :  { %10 = vsyncpa [#allocation4], 0  ;;  %s364_s12 = smov [#allocation5]   ;;  %s365_s14 = smov [#allocation2]  }
   0x3   :  { %s29_s13 = sshll.u32 %s364_s12, 4  ;;  %s16_s15 = sshll.u32 %s365_s14, 4  ;;  %s30_s13 = int_to_ptr.vmem [resolvable:$true] %s29_s13  ;;  %s392_s15 = int_to_ptr.vmem [resolvable:$true] %s16_s15 }
   0x4   :  { %s270_s18 = scalar_lea.hbm %s495_s1, 64 }
   0x5   :  { %p271_p0 = scmp.ne.s32.totalorder %s495_s1, %s270_s18  ;;  %p274_p1 = scmp.lt.u32.totalorder %s270_s18, %s495_s1 }
   0x7   :  { %p276_p2 = pnand %p274_p1, %p271_p0 }
   0x9   :  { %279 = shalt.err (!%p276_p2)
}
   0xa   :  { %s280_s23 = scalar_lea.vmem %s30_s13, 64  ;;  %p285_p4 = scmp.lt.s32.totalorder %s30_s13, %s30_s13 }
   0xb   :  { %p281_p3 = scmp.ne.s32.totalorder %s30_s13, %s280_s23  ;;  %p286_p5 = scmp.lt.s32.totalorder %s280_s23, %s280_s23 }
   0xd   :  { %p287_p6 = por %p286_p5, %p285_p4 }
   0xf   :  { %p288_p7 = pnand %p287_p6, %p281_p3 }
  0x11   :  { %291 = shalt.err (!%p288_p7)
}
  0x12   :  { %32 = dma.hbm_to_vmem [thread:$0]  %s495_s1, 64, %s30_s13, [#allocation6]  }
  0x13   :  { %s292_s28 = scalar_lea.hbm %s494_s0, 256 }
  0x14   :  { %p293_p8 = scmp.ne.s32.totalorder %s494_s0, %s292_s28  ;;  %p296_p9 = scmp.lt.u32.totalorder %s292_s28, %s494_s0 }
  0x16   :  { %p298_p10 = pnand %p296_p9, %p293_p8 }
  0x18   :  { %301 = shalt.err (!%p298_p10)
}
  0x19   :  { %s302_s6 = scalar_lea.vmem %s392_s15, 256  ;;  %p307_p12 = scmp.lt.s32.totalorder %s392_s15, %s392_s15 }
  0x1a   :  { %p303_p11 = scmp.ne.s32.totalorder %s392_s15, %s302_s6  ;;  %p308_p13 = scmp.lt.s32.totalorder %s302_s6, %s302_s6 }
  0x1c   :  { %p309_p0 = por %p308_p13, %p307_p12 }
  0x1e   :  { %p310_p1 = pnand %p309_p0, %p303_p11 }
  0x20   :  { %313 = shalt.err (!%p310_p1)
}
  0x21   :  { %s366_s1 = smov 128   ;;  %s367_s7 = smov 8  }
  0x22   :  { %22 = dma.hbm_to_vmem [thread:$0]  %s494_s0, 256, %s392_s15, [#allocation3], %s366_s1, %s366_s1, %s367_s7  }
  0x23   :  { %s368_s10 = smov [#allocation7]   ;;  %s314_s14 = scalar_lea.hbm %s496_s2, 64 }
  0x24   :  { %s39_s11 = sshll.u32 %s368_s10, 4  ;;  %p315_p2 = scmp.ne.s32.totalorder %s496_s2, %s314_s14  ;;  %s40_s11 = int_to_ptr.vmem [resolvable:$true] %s39_s11 }
  0x25   :  { %p318_p3 = scmp.lt.u32.totalorder %s314_s14, %s496_s2 }
  0x27   :  { %p320_p4 = pnand %p318_p3, %p315_p2 }
  0x29   :  { %323 = shalt.err (!%p320_p4)
}
  0x2a   :  { %s324_s20 = scalar_lea.vmem %s40_s11, 64  ;;  %p329_p6 = scmp.lt.s32.totalorder %s40_s11, %s40_s11 }
  0x2b   :  { %p325_p5 = scmp.ne.s32.totalorder %s40_s11, %s324_s20  ;;  %p330_p7 = scmp.lt.s32.totalorder %s324_s20, %s324_s20 }
  0x2d   :  { %p331_p8 = por %p330_p7, %p329_p6 }
  0x2f   :  { %p332_p9 = pnand %p331_p8, %p325_p5 }
  0x31   :  { %335 = shalt.err (!%p332_p9)
}
  0x32   :  { %42 = dma.hbm_to_vmem [thread:$0]  %s496_s2, 64, %s40_s11, [#allocation6]  }
  0x33   :  { %358 = dma.done.wait [#allocation3], 256  }
  0x34   :  { %359 = vsyncadd [#allocation3], 4294967040 }
  0x35   :  { %360 = dma.done.wait [#allocation6], 128  }
  0x36   :  { %361 = vsyncadd [#allocation6], 4294967168  ;;  %vm60_vm0 = vcmask 1043456   ;;  %v438_v0 = vld [vmem:[#allocation2] sm:$0xff]  ;;  %v440_v1 = vld [vmem:[#allocation2 + $0x8] sm:$0xff]  ;;  %v84_v12 = vlaneseq  ;;  %v370_v51 = vmov 0  }
  0x37   :  { %v56_v2 = vcombine.high %v438_v0, %v438_v0  ;;  %v61_v3 = vsel %vm60_vm0, %v438_v0, 0.0  ;;  %v57_v4 = vcombine.high %v440_v1, %v440_v1  ;;  %v66_v6 = vsel %vm60_vm0, %v440_v1, 0.0  ;;  %260 = vset.pattern.permute.xlu0 %v370_v51  ;;  %261 = vset.pattern.permute.xlu1 %v370_v51  ;;  %s371_s2 = smov [#allocation8]  }
  0x38   :  { %v369_v10 = vmov 839922192   ;;  %v85_v14 = vshrl.u32 %v84_v12, 7  ;;  %s239_s21 = sshll.u32 %s371_s2, 4  ;;  %s240_s21 = int_to_ptr.vmem [resolvable:$true] %s239_s21 }
  0x39   :  { %v62_v5 = vsel %vm60_vm0, %v56_v2, 0.0  ;;  %v67_v7 = vsel %vm60_vm0, %v57_v4, 0.0  ;;  %v82_v11 = vunpack.c.l.s4 %v369_v10  ;;  %s336_s22 = scalar_lea.vmem %s240_s21, 256  ;;  %p341_p11 = scmp.lt.s32.totalorder %s240_s21, %s240_s21 }
  0x3a   :  { %v63_v8 = vadd.f32 %v62_v5, %v61_v3  ;;  %v68_v9 = vadd.f32 %v67_v7, %v66_v6  ;;  %p337_p10 = scmp.ne.s32.totalorder %s240_s21, %s336_s22  ;;  %p342_p12 = scmp.lt.s32.totalorder %s336_s22, %s336_s22 }
  0x3b   :  { %v83_v13 = vunpack.c.0.s8 %v82_v11 }
  0x3c   :  { %64 = vadd.xlane.f32.xlu0 %v63_v8  ;;  %p343_p13 = por %p342_p12, %p341_p11 }
  0x3d   :  { %v452_v15 = vsub.s32 %v83_v13, %v85_v14  ;;  %v159_v13 = vld [vmem:[#allocation5] sm:$0xf] }
  0x3e   :  { %p344_p0 = pnand %p343_p13, %p337_p10 }
  0x40   :  { %69 = vadd.xlane.f32.xlu0 %v68_v9 }
  0xc9   :  { %v65_v16 = vpop.xlane.xlu0 %64 }
  0xca   :  { %v72_v17 = vmul.f32 0.00390625, %v65_v16  ;;  %v74_v20 = vsel %vm60_vm0, %v65_v16, 0.0 }
  0xcc   :  { %v87_v18 = vrot.slane %v72_v17, %v452_v15  ;;  %v170_v4 = vmul.f32 0.5, %v72_v17  ;;  %v160_v17 = vld [vmem:[#allocation7] sm:$0xf] }
  0xcd   :  { %v70_v19 = vpop.xlane.xlu0 %69 }
  0xce   :  { %v73_v21 = vmul.f32 0.00390625, %v70_v19  ;;  %v75_v22 = vsel %vm60_vm0, %v70_v19, 0.0  ;;  %v97_v23 = vsub.f32 %v438_v0, %v87_v18 }
  0xcf   :  { %v76_v24 = vadd.f32 %v75_v22, %v74_v20 }
  0xd0   :  { %v99_v25 = vmul.f32 %v97_v23, %v97_v23  ;;  %v94_v27 = vrot.slane %v73_v21, %v452_v15  ;;  %v171_v7 = vmul.f32 0.5, %v73_v21 }
  0xd1   :  { %v78_v26 = vmul.f32 0.001953125, %v76_v24 }
  0xd2   :  { %v103_v28 = vcombine.high %v99_v25, %v99_v25  ;;  %v107_v30 = vsel %vm60_vm0, %v99_v25, 0.0  ;;  %v98_v35 = vsub.f32 %v440_v1, %v94_v27 }
  0xd3   :  { %v127_v29 = vrot.slane %v78_v26, %v452_v15  ;;  %v168_v5 = vmul.f32 0.5, %v78_v26 }
  0xd4   :  { %v108_v31 = vsel %vm60_vm0, %v103_v28, 0.0  ;;  %v100_v40 = vmul.f32 %v98_v35, %v98_v35 }
  0xd5   :  { %v109_v32 = vadd.f32 %v108_v31, %v107_v30  ;;  %v129_v33 = vsub.f32 %v438_v0, %v127_v29  ;;  %v130_v34 = vsub.f32 %v440_v1, %v127_v29 }
  0xd6   :  { %v104_v45 = vcombine.high %v100_v40, %v100_v40  ;;  %v112_v49 = vsel %vm60_vm0, %v100_v40, 0.0 }
  0xd7   :  { %110 = vadd.xlane.f32.xlu0 %v109_v32  ;;  %v131_v36 = vmul.f32 %v129_v33, %v129_v33  ;;  %v132_v37 = vmul.f32 %v130_v34, %v130_v34 }
  0xd8   :  { %v113_v48 = vsel %vm60_vm0, %v104_v45, 0.0 }
  0xd9   :  { %v135_v38 = vcombine.high %v131_v36, %v131_v36  ;;  %v136_v39 = vcombine.high %v132_v37, %v132_v37  ;;  %v139_v41 = vsel %vm60_vm0, %v131_v36, 0.0  ;;  %v144_v46 = vsel %vm60_vm0, %v132_v37, 0.0 }
  0xda   :  { %v114_v50 = vadd.f32 %v113_v48, %v112_v49 }
  0xdb   :  { %v140_v42 = vsel %vm60_vm0, %v135_v38, 0.0  ;;  %v145_v44 = vsel %vm60_vm0, %v136_v39, 0.0 }
  0xdc   :  { %v141_v43 = vadd.f32 %v140_v42, %v139_v41  ;;  %v146_v47 = vadd.f32 %v145_v44, %v144_v46 }
  0xde   :  { %142 = vadd.xlane.f32.xlu1 %v141_v43 }
  0xe2   :  { %147 = vadd.xlane.f32.xlu1 %v146_v47 }
  0xe6   :  { %115 = vadd.xlane.f32.xlu1 %v114_v50 }
 0x164   :  { %v111_v52 = vpop.xlane.xlu0 %110 }
 0x165   :  { %v118_v54 = vmul.f32 0.003921569, %v111_v52 }
 0x167   :  { %v155_v58 = vadd.f32 1e-05, %v118_v54 }
 0x169   :  { %264 = vrsqrt.f32 %v155_v58 }
 0x16b   :  { %v143_v53 = vpop.xlane.xlu1 %142 }
 0x16c   :  { %v149_v56 = vsel %vm60_vm0, %v143_v53, 0.0 }
 0x16f   :  { %v148_v55 = vpop.xlane.xlu1 %147 }
 0x170   :  { %v150_v57 = vsel %vm60_vm0, %v148_v55, 0.0 }
 0x171   :  { %v151_v59 = vadd.f32 %v150_v57, %v149_v56 }
 0x173   :  { %v152_v60 = vmul.f32 0.001953125, %v151_v59  ;;  %v116_v61 = vpop.xlane.xlu1 %115  ;;  %v265_v3 = vpop.eup %264 }
 0x174   :  { %v119_v62 = vmul.f32 0.003921569, %v116_v61  ;;  %v162_v10 = vmul.f32 0.5, %v265_v3  ;;  %v172_v12 = vmul.f32 %v265_v3, %v170_v4 }
 0x175   :  { %v153_v63 = vadd.f32 1e-05, %v152_v60 }
 0x176   :  { %v156_v2 = vadd.f32 1e-05, %v119_v62 }
 0x177   :  { %266 = vrsqrt.f32 %v153_v63 }
 0x178   :  { %268 = vrsqrt.f32 %v156_v2 }
 0x181   :  { %v267_v6 = vpop.eup %266 }
 0x182   :  { %v269_v8 = vpop.eup %268  ;;  %v161_v9 = vmul.f32 0.5, %v267_v6  ;;  %v169_v11 = vmul.f32 %v267_v6, %v168_v5 }
 0x183   :  { %v163_v14 = vmul.f32 0.5, %v269_v8  ;;  %v173_v16 = vmul.f32 %v269_v8, %v171_v7 }
 0x184   :  { %v164_v18 = vadd.f32 %v162_v10, %v161_v9  ;;  %v174_v19 = vadd.f32 %v172_v12, %v169_v11 }
 0x185   :  { %v165_v20 = vadd.f32 %v163_v14, %v161_v9  ;;  %v175_v22 = vadd.f32 %v173_v16, %v169_v11 }
 0x186   :  { %v166_v23 = vmul.f32 %v164_v18, %v159_v13  ;;  %v176_v25 = vmul.f32 %v174_v19, %v159_v13 }
 0x187   :  { %v167_v24 = vmul.f32 %v165_v20, %v159_v13  ;;  %v177_v21 = vmul.f32 %v175_v22, %v159_v13 }
 0x188   :  { %182 = vperm.xlu0 %260, %v166_v23   ;;  %v178_v26 = vsub.f32 %v160_v17, %v176_v25 }
 0x189   :  { %186 = vperm.xlu1 %261, %v167_v24   ;;  %v179_v27 = vsub.f32 %v160_v17, %v177_v21 }
 0x18d   :  { %208 = vperm.xlu1 %261, %v178_v26  }
 0x191   :  { %212 = vperm.xlu1 %261, %v179_v27  }
 0x207   :  { %v183_v28 = vpop.permute.xlu0 %182 }
 0x208   :  { %v187_v29 = vpop.permute.xlu1 %186  ;;  %v194_v30 = vrot.slane %v183_v28, %v452_v15 }
 0x209   :  { %v201_v33 = vrot.slane %v187_v29, %v452_v15 }
 0x20a   :  { %v204_v32 = vmul.f32 %v194_v30, %v438_v0 }
 0x20b   :  { %v205_v37 = vmul.f32 %v201_v33, %v440_v1 }
 0x20c   :  { %v209_v31 = vpop.permute.xlu1 %208 }
 0x20d   :  { %v220_v34 = vrot.slane %v209_v31, %v452_v15 }
 0x20f   :  { %v230_v35 = vadd.f32 %v220_v34, %v204_v32 }
 0x210   :  { %v213_v36 = vpop.permute.xlu1 %212 }
 0x211   :  { %232 = vst [vmem:[#allocation8] sm:$0xff] %v230_v35  ;;  %v227_v38 = vrot.slane %v213_v36, %v452_v15 }
 0x213   :  { %v231_v39 = vadd.f32 %v227_v38, %v205_v37 }
 0x215   :  { %233 = vst [vmem:[#allocation8 + $0x8] sm:$0xff] %v231_v39 }
 0x216   :  { %347 = shalt.err (!%p344_p0)
}
 0x217   :  { %s348_s25 = scalar_lea.hbm %s497_s3, 256 }
 0x218   :  { %p349_p1 = scmp.ne.s32.totalorder %s497_s3, %s348_s25  ;;  %p352_p2 = scmp.lt.u32.totalorder %s348_s25, %s497_s3 }
 0x21a   :  { %p354_p3 = pnand %p352_p2, %p349_p1 }
 0x21c   :  { %357 = shalt.err (!%p354_p3)
}
 0x21d   :  { %245 = dma.vmem_to_hbm [thread:$0]  %s240_s21, 256, %s497_s3, [#allocation4], %s366_s1, %s366_s1, %s367_s7  }
 0x21e   :  { %362 = dma.done.wait [#allocation4], 256  }
 0x21f   :  { %363 = vsyncadd [#allocation4], 4294967040 }
 0x220   :  { %249 = vsyncpa [#allocation3], 1 }
 0x221   :  { %250 = vsyncpa [#allocation6], 1 }
 0x222   :  { %251 = vsyncpa [#allocation4], 1 }

</bundles_post_ra>
